<compile_context>
chip_gen: v6e
topology: v6e:2x2x1
jax: 0.10.0
libtpu: 0.0.40
codegen_flags: <defaults>
</compile_context>

<pallas_src>
import functools

import jax
import jax.numpy as jnp
from jax.experimental import pallas as pl
from jax.experimental.pallas import tpu as pltpu


def _round_up(x, m):
    return ((x + m - 1) // m) * m


# ---------------------------------------------------------------------------
# Pallas kernel: GMF product + MLP tower + predict layer (one batch tile)
# ---------------------------------------------------------------------------
def ncf_kernel(
    eu_ref,      # (TB, MD+F)  user row  [MLP | GMF], bf16
    ei_ref,      # (TB, MD+F)  item row  [MLP | GMF], bf16
    w1_ref,      # (2*MD, 128) bf16
    b1_ref,      # (1, 128)    f32
    w2_ref,      # (128, 64)   bf16
    b2_ref,      # (1, 64)     f32
    w3_ref,      # (64, 32)    bf16
    b3_ref,      # (1, 32)     f32
    wpg_ref,     # (1, F)      predict weights, GMF half, f32
    wpm_ref,     # (1, F)      predict weights, MLP half, f32
    bp_ref,      # (1,)        predict bias scalar, SMEM, f32
    out_ref,     # (TB, 1)     output, f32
    *,
    md,
    fdim,
):
    f32 = jnp.float32
    bf16 = jnp.bfloat16

    # 128-lane-aligned static slices of the packed bf16 embedding rows.
    eu_mlp = eu_ref[:, 0:md]              # (TB, MD) bf16
    ei_mlp = ei_ref[:, 0:md]              # (TB, MD) bf16
    eu_gmf = eu_ref[:, md:md + fdim]      # (TB, F)  bf16
    ei_gmf = ei_ref[:, md:md + fdim]      # (TB, F)  bf16

    # ---- GMF branch: elementwise product in f32 (VPU) ----------------------
    gmf = eu_gmf.astype(f32) * ei_gmf.astype(f32)                 # (TB, F)

    # ---- MLP branch: Linear(256,128)+ReLU -> (128,64)+ReLU -> (64,32)+ReLU
    # (Dropout p=0.0 -> identity.) Layer-1 weight split over the two halves so
    # the concat([user, item]) never materializes: x_cat @ W1 == xu@W1[:MD] +
    # xi@W1[MD:].
    w1u = w1_ref[0:md, :]                                         # (MD, 128) bf16
    w1i = w1_ref[md:2 * md, :]                                    # (MD, 128) bf16
    h = (
        jnp.dot(eu_mlp, w1u, preferred_element_type=f32)
        + jnp.dot(ei_mlp, w1i, preferred_element_type=f32)
        + b1_ref[...]
    )
    h = jnp.maximum(h, 0.0)
    h = jnp.dot(h.astype(bf16), w2_ref[...], preferred_element_type=f32) + b2_ref[...]
    h = jnp.maximum(h, 0.0)
    h = jnp.dot(h.astype(bf16), w3_ref[...], preferred_element_type=f32) + b3_ref[...]
    h = jnp.maximum(h, 0.0)                                       # (TB, 32)

    # ---- Predict layer: concat([gmf, h], -1) @ Wp + bp ----------------------
    # VPU multiply + cross-lane sum (XLU) instead of an N=1 MXU matmul.
    pred = (
        jnp.sum(gmf * wpg_ref[...], axis=-1, keepdims=True)
        + jnp.sum(h * wpm_ref[...], axis=-1, keepdims=True)
        + bp_ref[0]
    )
    out_ref[...] = pred.astype(out_ref.dtype)


# ---------------------------------------------------------------------------
# One-time parameter preparation (outside the jitted forward): fuse each
# entity's GMF+MLP embeddings into one bf16 table row, pre-cast MXU weights.
# ---------------------------------------------------------------------------
def prepare_inference_params(params):
    bf16, f32 = jnp.bfloat16, jnp.float32
    fdim = params["embed_user_GMF"].shape[-1]
    user_table = jnp.concatenate(
        [params["embed_user_MLP"], params["embed_user_GMF"]], axis=-1
    ).astype(bf16)                                   # (user_num, MD+F)
    item_table = jnp.concatenate(
        [params["embed_item_MLP"], params["embed_item_GMF"]], axis=-1
    ).astype(bf16)                                   # (item_num, MD+F)
    wp = params["wp"].astype(f32)                    # (2F, 1)
    return {
        "user_table": user_table,
        "item_table": item_table,
        "w1": params["w1"].astype(bf16),
        "b1": params["b1"].astype(f32),
        "w2": params["w2"].astype(bf16),
        "b2": params["b2"].astype(f32),
        "w3": params["w3"].astype(bf16),
        "b3": params["b3"].astype(f32),
        "wp_gmf": wp[:fdim, 0].reshape(1, fdim),
        "wp_mlp": wp[fdim:, 0].reshape(1, fdim),
        "bp": params["bp"].reshape(-1).astype(f32),  # (1,)
    }


# ---------------------------------------------------------------------------
# Wrapper: fused embedding gather (JAX glue) + batch-tiled pallas_call
# ---------------------------------------------------------------------------
def ncf_forward(prepared, user, item, *, block_rows=2048):
    md = prepared["w1"].shape[0] // 2                # 128
    fdim = prepared["wp_gmf"].shape[-1]              # 32
    feat = md + fdim
    assert prepared["user_table"].shape[-1] == feat

    # Data-dependent gathers stay in plain JAX: one bf16 row per id.
    # TODO(synk): gather could be fused into the kernel (scalar-prefetched ids
    # + manual per-row DMA), but single 320 B row DMAs are descriptor-bound.
    eu = prepared["user_table"][user]                # (B, MD+F) bf16
    ei = prepared["item_table"][item]                # (B, MD+F) bf16

    B = user.shape[0]
    # Batch tile: multiple of 16 (covers bf16 sublane packing).
    tb = _round_up(min(block_rows, B), 16)
    Bp = _round_up(B, tb)
    # Keep >=2 grid steps when the batch is large enough so the "parallel"
    # batch axis can shard across both TensorCores on v7x (no-op on v5e/v6e).
    if Bp // tb < 2 and B > 512:
        tb = _round_up(-(-B // 2), 16)
        Bp = _round_up(B, tb)
    if Bp != B:
        pad = ((0, Bp - B), (0, 0))
        eu = jnp.pad(eu, pad)
        ei = jnp.pad(ei, pad)
    grid = (Bp // tb,)

    def act():       # batch-tiled activation spec
        return pl.BlockSpec((tb, feat), lambda i: (i, 0))

    def res(shape):  # grid-resident weight/bias spec (constant block index)
        return pl.BlockSpec(shape, lambda i: (0, 0))

    smem = pl.BlockSpec(memory_space=pltpu.MemorySpace.SMEM)

    kernel = functools.partial(ncf_kernel, md=md, fdim=fdim)
    out = pl.pallas_call(
        kernel,
        out_shape=jax.ShapeDtypeStruct((Bp, 1), jnp.float32),
        grid=grid,
        in_specs=[
            act(), act(),
            res(prepared["w1"].shape), res(prepared["b1"].shape),
            res(prepared["w2"].shape), res(prepared["b2"].shape),
            res(prepared["w3"].shape), res(prepared["b3"].shape),
            res(prepared["wp_gmf"].shape), res(prepared["wp_mlp"].shape),
            smem,
        ],
        out_specs=pl.BlockSpec((tb, 1), lambda i: (i, 0)),
        compiler_params=pltpu.CompilerParams(
            dimension_semantics=("parallel",),
            vmem_limit_bytes=32 * 1024 * 1024,
        ),
    )(
        eu, ei,
        prepared["w1"], prepared["b1"],
        prepared["w2"], prepared["b2"],
        prepared["w3"], prepared["b3"],
        prepared["wp_gmf"], prepared["wp_mlp"],
        prepared["bp"],
    )
    return out[:B]  # (B, 1)
    # TODO(synk): PyTorch forward returns tuple(prediction) (tuple of rows) and
    # prints; we return the (B, 1) array instead.


# ---------------------------------------------------------------------------
# Deterministic parameter construction (shapes from NCF.__init__ with
# factor_num=32, num_layers=3, matching the hard-coded MLP sizes).
# ---------------------------------------------------------------------------
def make_params(key, user_num, item_num, factor_num=32, num_layers=3):
    mlp_dim = factor_num * 2 ** (num_layers - 1)  # 128
    keys = jax.random.split(key, 8)

    def xavier(k, fan_in, fan_out):
        limit = (6.0 / (fan_in + fan_out)) ** 0.5
        return jax.random.uniform(
            k, (fan_in, fan_out), jnp.float32, minval=-limit, maxval=limit
        )

    return {
        "embed_user_GMF": 0.01 * jax.random.normal(keys[0], (user_num, factor_num), jnp.float32),
        "embed_item_GMF": 0.01 * jax.random.normal(keys[1], (item_num, factor_num), jnp.float32),
        "embed_user_MLP": 0.01 * jax.random.normal(keys[2], (user_num, mlp_dim), jnp.float32),
        "embed_item_MLP": 0.01 * jax.random.normal(keys[3], (item_num, mlp_dim), jnp.float32),
        # MLP tower, weights pre-transposed to (in, out), xavier-uniform init
        "w1": xavier(keys[4], 2 * mlp_dim, 128),
        "b1": jnp.zeros((1, 128), jnp.float32),
        "w2": xavier(keys[5], 128, 64),
        "b2": jnp.zeros((1, 64), jnp.float32),
        "w3": xavier(keys[6], 64, 32),
        "b3": jnp.zeros((1, 32), jnp.float32),
        # predict layer (kaiming-uniform a=1 -> uniform(+-sqrt(3/fan_in)))
        "wp": jax.random.uniform(
            keys[7], (2 * factor_num, 1), jnp.float32,
            minval=-((3.0 / (2 * factor_num)) ** 0.5),
            maxval=(3.0 / (2 * factor_num)) ** 0.5,
        ),
        "bp": jnp.zeros((1, 1), jnp.float32),
    }


# ---------------------------------------------------------------------------
# Reference (plain JAX) mirroring the kernel's numerics: bf16 embedding
# tables, bf16 MXU matmuls with f32 accumulation, split layer-1 weight,
# everything else f32.
# ---------------------------------------------------------------------------
def ncf_reference(params, user, item):
    f32, bf16 = jnp.float32, jnp.bfloat16
    md = params["embed_user_MLP"].shape[-1]

    eu_gmf = params["embed_user_GMF"][user].astype(bf16).astype(f32)
    ei_gmf = params["embed_item_GMF"][item].astype(bf16).astype(f32)
    gmf = eu_gmf * ei_gmf

    eu_mlp = params["embed_user_MLP"][user].astype(bf16)
    ei_mlp = params["embed_item_MLP"][item].astype(bf16)
    w1 = params["w1"].astype(bf16)
    h = (
        jnp.dot(eu_mlp, w1[:md], preferred_element_type=f32)
        + jnp.dot(ei_mlp, w1[md:], preferred_element_type=f32)
        + params["b1"]
    )
    h = jnp.maximum(h, 0.0)
    h = jnp.dot(h.astype(bf16), params["w2"].astype(bf16),
                preferred_element_type=f32) + params["b2"]
    h = jnp.maximum(h, 0.0)
    h = jnp.dot(h.astype(bf16), params["w3"].astype(bf16),
                preferred_element_type=f32) + params["b3"]
    h = jnp.maximum(h, 0.0)

    concat = jnp.concatenate([gmf, h], axis=-1)
    return concat @ params["wp"] + params["bp"]


if __name__ == "__main__":
    USER_NUM, ITEM_NUM = 64, 128
    FACTOR_NUM, NUM_LAYERS = 32, 3
    B = 40              # batch of (user, item) pairs
    BLOCK_ROWS = 16     # small tile so the test exercises grid + padding

    key = jax.random.PRNGKey(0)
    k_params, k_user, k_item = jax.random.split(key, 3)

    params = make_params(k_params, USER_NUM, ITEM_NUM, FACTOR_NUM, NUM_LAYERS)
    user = jax.random.randint(k_user, (B,), 0, USER_NUM, dtype=jnp.int32)
    item = jax.random.randint(k_item, (B,), 0, ITEM_NUM, dtype=jnp.int32)

    prepared = prepare_inference_params(params)   # one-time, outside the jit
    fwd = jax.jit(functools.partial(ncf_forward, block_rows=BLOCK_ROWS))
    pred = jax.block_until_ready(fwd(prepared, user, item))
    ref = jax.block_until_ready(ncf_reference(params, user, item))

    assert pred.shape == (B, 1), pred.shape
    assert bool(jnp.all(jnp.isfinite(pred)))
    assert jnp.allclose(pred, ref, atol=1e-5, rtol=1e-2), (pred, ref)
    print("KERNEL_OK")
</pallas_src>

<mosaic_0001>
module attributes {stable_mosaic.version = 11 : i64} {
  func.func @ncf_kernel(%arg0: i32, %arg1: memref<16x160xbf16, #tpu.memory_space<vmem>>, %arg2: memref<16x160xbf16, #tpu.memory_space<vmem>>, %arg3: memref<256x128xbf16, #tpu.memory_space<vmem>>, %arg4: memref<1x128xf32, #tpu.memory_space<vmem>>, %arg5: memref<128x64xbf16, #tpu.memory_space<vmem>>, %arg6: memref<1x64xf32, #tpu.memory_space<vmem>>, %arg7: memref<64x32xbf16, #tpu.memory_space<vmem>>, %arg8: memref<1x32xf32, #tpu.memory_space<vmem>>, %arg9: memref<1x32xf32, #tpu.memory_space<vmem>>, %arg10: memref<1x32xf32, #tpu.memory_space<vmem>>, %arg11: memref<1xf32, #tpu.memory_space<smem>>, %arg12: memref<16x1xf32, #tpu.memory_space<vmem>>) attributes {dimension_semantics = [#tpu.dimension_semantics<parallel>], iteration_bounds = array<i64: 3>, scalar_prefetch = 0 : i64, scratch_operands = 0 : i64, tpu.core_type = #tpu.core_type<tc>, window_params = [{transform_indices = @transform_0, window_bounds = array<i64: 16, 160>}, {transform_indices = @transform_1, window_bounds = array<i64: 16, 160>}, {pipeline_mode = #tpu.pipeline_mode<synchronous>, transform_indices = @transform_2, window_bounds = array<i64: 256, 128>}, {pipeline_mode = #tpu.pipeline_mode<synchronous>, transform_indices = @transform_3, window_bounds = array<i64: 1, 128>}, {pipeline_mode = #tpu.pipeline_mode<synchronous>, transform_indices = @transform_4, window_bounds = array<i64: 128, 64>}, {pipeline_mode = #tpu.pipeline_mode<synchronous>, transform_indices = @transform_5, window_bounds = array<i64: 1, 64>}, {pipeline_mode = #tpu.pipeline_mode<synchronous>, transform_indices = @transform_6, window_bounds = array<i64: 64, 32>}, {pipeline_mode = #tpu.pipeline_mode<synchronous>, transform_indices = @transform_7, window_bounds = array<i64: 1, 32>}, {pipeline_mode = #tpu.pipeline_mode<synchronous>, transform_indices = @transform_8, window_bounds = array<i64: 1, 32>}, {pipeline_mode = #tpu.pipeline_mode<synchronous>, transform_indices = @transform_9, window_bounds = array<i64: 1, 32>}, {transform_indices = @transform_10, window_bounds = array<i64: 1>}, {transform_indices = @transform_11, window_bounds = array<i64: 16, 1>}]} {
    %c0 = arith.constant 0 : index
    %c0_0 = arith.constant 0 : index
    %0 = vector.load %arg1[%c0, %c0_0] : memref<16x160xbf16, #tpu.memory_space<vmem>>, vector<16x128xbf16>
    %c0_1 = arith.constant 0 : index
    %c0_2 = arith.constant 0 : index
    %1 = vector.load %arg2[%c0_1, %c0_2] : memref<16x160xbf16, #tpu.memory_space<vmem>>, vector<16x128xbf16>
    %c0_3 = arith.constant 0 : index
    %c128 = arith.constant 128 : index
    %2 = vector.load %arg1[%c0_3, %c128] : memref<16x160xbf16, #tpu.memory_space<vmem>>, vector<16x32xbf16>
    %c0_4 = arith.constant 0 : index
    %c128_5 = arith.constant 128 : index
    %3 = vector.load %arg2[%c0_4, %c128_5] : memref<16x160xbf16, #tpu.memory_space<vmem>>, vector<16x32xbf16>
    %4 = arith.extf %2 : vector<16x32xbf16> to vector<16x32xf32>
    %5 = arith.extf %3 : vector<16x32xbf16> to vector<16x32xf32>
    %6 = arith.mulf %4, %5 : vector<16x32xf32>
    %c0_6 = arith.constant 0 : index
    %c0_7 = arith.constant 0 : index
    %7 = vector.load %arg3[%c0_6, %c0_7] : memref<256x128xbf16, #tpu.memory_space<vmem>>, vector<128x128xbf16>
    %c128_8 = arith.constant 128 : index
    %c0_9 = arith.constant 0 : index
    %8 = vector.load %arg3[%c128_8, %c0_9] : memref<256x128xbf16, #tpu.memory_space<vmem>>, vector<128x128xbf16>
    %cst = arith.constant dense<0.000000e+00> : vector<16x128xf32>
    %9 = tpu.matmul %0, %7, %cst {dimension_numbers = #tpu.dot_dimension_numbers<[1], [0], [0], [1], [0, 0, 1, 1], [], []>} : vector<16x128xbf16>, vector<128x128xbf16>, vector<16x128xf32> -> vector<16x128xf32>
    %cst_10 = arith.constant dense<0.000000e+00> : vector<16x128xf32>
    %10 = tpu.matmul %1, %8, %cst_10 {dimension_numbers = #tpu.dot_dimension_numbers<[1], [0], [0], [1], [0, 0, 1, 1], [], []>} : vector<16x128xbf16>, vector<128x128xbf16>, vector<16x128xf32> -> vector<16x128xf32>
    %11 = arith.addf %9, %10 : vector<16x128xf32>
    %c0_11 = arith.constant 0 : index
    %c0_12 = arith.constant 0 : index
    %12 = vector.load %arg4[%c0_11, %c0_12] : memref<1x128xf32, #tpu.memory_space<vmem>>, vector<1x128xf32>
    %13 = vector.broadcast %12 : vector<1x128xf32> to vector<16x128xf32>
    %14 = arith.addf %11, %13 : vector<16x128xf32>
    %cst_13 = arith.constant 0.000000e+00 : f32
    %15 = vector.broadcast %cst_13 : f32 to vector<16x128xf32>
    %16 = arith.maximumf %14, %15 : vector<16x128xf32>
    %17 = arith.truncf %16 : vector<16x128xf32> to vector<16x128xbf16>
    %c0_14 = arith.constant 0 : index
    %c0_15 = arith.constant 0 : index
    %18 = vector.load %arg5[%c0_14, %c0_15] : memref<128x64xbf16, #tpu.memory_space<vmem>>, vector<128x64xbf16>
    %cst_16 = arith.constant dense<0.000000e+00> : vector<16x64xf32>
    %19 = tpu.matmul %17, %18, %cst_16 {dimension_numbers = #tpu.dot_dimension_numbers<[1], [0], [0], [1], [0, 0, 1, 1], [], []>} : vector<16x128xbf16>, vector<128x64xbf16>, vector<16x64xf32> -> vector<16x64xf32>
    %c0_17 = arith.constant 0 : index
    %c0_18 = arith.constant 0 : index
    %20 = vector.load %arg6[%c0_17, %c0_18] : memref<1x64xf32, #tpu.memory_space<vmem>>, vector<1x64xf32>
    %21 = vector.broadcast %20 : vector<1x64xf32> to vector<16x64xf32>
    %22 = arith.addf %19, %21 : vector<16x64xf32>
    %cst_19 = arith.constant 0.000000e+00 : f32
    %23 = vector.broadcast %cst_19 : f32 to vector<16x64xf32>
    %24 = arith.maximumf %22, %23 : vector<16x64xf32>
    %25 = arith.truncf %24 : vector<16x64xf32> to vector<16x64xbf16>
    %c0_20 = arith.constant 0 : index
    %c0_21 = arith.constant 0 : index
    %26 = vector.load %arg7[%c0_20, %c0_21] : memref<64x32xbf16, #tpu.memory_space<vmem>>, vector<64x32xbf16>
    %cst_22 = arith.constant dense<0.000000e+00> : vector<16x32xf32>
    %27 = tpu.matmul %25, %26, %cst_22 {dimension_numbers = #tpu.dot_dimension_numbers<[1], [0], [0], [1], [0, 0, 1, 1], [], []>} : vector<16x64xbf16>, vector<64x32xbf16>, vector<16x32xf32> -> vector<16x32xf32>
    %c0_23 = arith.constant 0 : index
    %c0_24 = arith.constant 0 : index
    %28 = vector.load %arg8[%c0_23, %c0_24] : memref<1x32xf32, #tpu.memory_space<vmem>>, vector<1x32xf32>
    %29 = vector.broadcast %28 : vector<1x32xf32> to vector<16x32xf32>
    %30 = arith.addf %27, %29 : vector<16x32xf32>
    %cst_25 = arith.constant 0.000000e+00 : f32
    %31 = vector.broadcast %cst_25 : f32 to vector<16x32xf32>
    %32 = arith.maximumf %30, %31 : vector<16x32xf32>
    %c0_26 = arith.constant 0 : index
    %c0_27 = arith.constant 0 : index
    %33 = vector.load %arg9[%c0_26, %c0_27] : memref<1x32xf32, #tpu.memory_space<vmem>>, vector<1x32xf32>
    %34 = vector.broadcast %33 : vector<1x32xf32> to vector<16x32xf32>
    %35 = arith.mulf %6, %34 : vector<16x32xf32>
    %cst_28 = arith.constant dense<0.000000e+00> : vector<16xf32>
    %36 = vector.multi_reduction <add>, %35, %cst_28 [1] : vector<16x32xf32> to vector<16xf32>
    %37 = vector.shape_cast %36 : vector<16xf32> to vector<16x1xf32>
    %c0_29 = arith.constant 0 : index
    %c0_30 = arith.constant 0 : index
    %38 = vector.load %arg10[%c0_29, %c0_30] : memref<1x32xf32, #tpu.memory_space<vmem>>, vector<1x32xf32>
    %39 = vector.broadcast %38 : vector<1x32xf32> to vector<16x32xf32>
    %40 = arith.mulf %32, %39 : vector<16x32xf32>
    %cst_31 = arith.constant dense<0.000000e+00> : vector<16xf32>
    %41 = vector.multi_reduction <add>, %40, %cst_31 [1] : vector<16x32xf32> to vector<16xf32>
    %42 = vector.shape_cast %41 : vector<16xf32> to vector<16x1xf32>
    %43 = arith.addf %37, %42 : vector<16x1xf32>
    %c0_32 = arith.constant 0 : index
    %44 = memref.load %arg11[%c0_32] : memref<1xf32, #tpu.memory_space<smem>>
    %45 = vector.broadcast %44 : f32 to vector<16x1xf32>
    %46 = arith.addf %43, %45 : vector<16x1xf32>
    %c0_33 = arith.constant 0 : index
    %c0_34 = arith.constant 0 : index
    %47 = vector.load %arg12[%c0_33, %c0_34] : memref<16x1xf32, #tpu.memory_space<vmem>>, vector<16x1xf32>
    tpu.vector_store %arg12[%c0_33, %c0_34], %46 {strides = array<i32>} : memref<16x1xf32, #tpu.memory_space<vmem>>, vector<16x1xf32>,
    return
  }
  func.func @transform_0(%arg0: i32) -> (i32, i32) {
    %c0_i32 = arith.constant 0 : i32
    %c0_i32_0 = arith.constant 0 : i32
    return %arg0, %c0_i32 : i32, i32
  }
  func.func @transform_1(%arg0: i32) -> (i32, i32) {
    %c0_i32 = arith.constant 0 : i32
    %c0_i32_0 = arith.constant 0 : i32
    return %arg0, %c0_i32 : i32, i32
  }
  func.func @transform_2(%arg0: i32) -> (i32, i32) {
    %c0_i32 = arith.constant 0 : i32
    %c0_i32_0 = arith.constant 0 : i32
    %c0_i32_1 = arith.constant 0 : i32
    return %c0_i32, %c0_i32_0 : i32, i32
  }
  func.func @transform_3(%arg0: i32) -> (i32, i32) {
    %c0_i32 = arith.constant 0 : i32
    %c0_i32_0 = arith.constant 0 : i32
    %c0_i32_1 = arith.constant 0 : i32
    return %c0_i32, %c0_i32_0 : i32, i32
  }
  func.func @transform_4(%arg0: i32) -> (i32, i32) {
    %c0_i32 = arith.constant 0 : i32
    %c0_i32_0 = arith.constant 0 : i32
    %c0_i32_1 = arith.constant 0 : i32
    return %c0_i32, %c0_i32_0 : i32, i32
  }
  func.func @transform_5(%arg0: i32) -> (i32, i32) {
    %c0_i32 = arith.constant 0 : i32
    %c0_i32_0 = arith.constant 0 : i32
    %c0_i32_1 = arith.constant 0 : i32
    return %c0_i32, %c0_i32_0 : i32, i32
  }
  func.func @transform_6(%arg0: i32) -> (i32, i32) {
    %c0_i32 = arith.constant 0 : i32
    %c0_i32_0 = arith.constant 0 : i32
    %c0_i32_1 = arith.constant 0 : i32
    return %c0_i32, %c0_i32_0 : i32, i32
  }
  func.func @transform_7(%arg0: i32) -> (i32, i32) {
    %c0_i32 = arith.constant 0 : i32
    %c0_i32_0 = arith.constant 0 : i32
    %c0_i32_1 = arith.constant 0 : i32
    return %c0_i32, %c0_i32_0 : i32, i32
  }
  func.func @transform_8(%arg0: i32) -> (i32, i32) {
    %c0_i32 = arith.constant 0 : i32
    %c0_i32_0 = arith.constant 0 : i32
    %c0_i32_1 = arith.constant 0 : i32
    return %c0_i32, %c0_i32_0 : i32, i32
  }
  func.func @transform_9(%arg0: i32) -> (i32, i32) {
    %c0_i32 = arith.constant 0 : i32
    %c0_i32_0 = arith.constant 0 : i32
    %c0_i32_1 = arith.constant 0 : i32
    return %c0_i32, %c0_i32_0 : i32, i32
  }
  func.func @transform_10(%arg0: i32) -> i32 {
    %c0_i32 = arith.constant 0 : i32
    %c0_i32_0 = arith.constant 0 : i32
    return %c0_i32 : i32
  }
  func.func @transform_11(%arg0: i32) -> (i32, i32) {
    %c0_i32 = arith.constant 0 : i32
    %c0_i32_0 = arith.constant 0 : i32
    return %arg0, %c0_i32 : i32, i32
  }
}

</mosaic_0001>

<bundles_post_ra>
// kernel: ncf_forward.1
= control target key start
LH: loop header
LB: loop body
LE: loop exit
PB: predicated region body
PF: predicated region fallthrough
CT: control target
= control target key end

     0   :  { %s1247_s19 = smov 0   ;;  %s1419_s0 = inlined_call_operand.vmem [shape: bf16[48,160], index: 0, kind: input, shape index: {}]   ;;  %s1420_s1 = inlined_call_operand.vmem [shape: bf16[48,160], index: 1, kind: input, shape index: {}]   ;;  %s1421_s2 = inlined_call_operand.vmem [shape: bf16[256,128], index: 2, kind: input, shape index: {}]   ;;  %s1422_s3 = inlined_call_operand.vmem [shape: f32[1,128], index: 3, kind: input, shape index: {}]   ;;  %s1423_s4 = inlined_call_operand.vmem [shape: bf16[128,64], index: 4, kind: input, shape index: {}]   ;;  %s1424_s5 = inlined_call_operand.vmem [shape: f32[1,64], index: 5, kind: input, shape index: {}]   ;;  %s1425_s6 = inlined_call_operand.vmem [shape: bf16[64,32], index: 6, kind: input, shape index: {}]   ;;  %s1426_s7 = inlined_call_operand.vmem [shape: f32[1,32], index: 7, kind: input, shape index: {}]   ;;  %s1427_s8 = inlined_call_operand.vmem [shape: f32[1,32], index: 8, kind: input, shape index: {}]   ;;  %s1428_s9 = inlined_call_operand.vmem [shape: f32[1,32], index: 9, kind: input, shape index: {}]   ;;  %s1429_s10 = inlined_call_operand.<no memory space> [shape: f32[1], index: 10, kind: input, shape index: {}]   ;;  %s1430_s11 = inlined_call_operand.vmem [shape: f32[48,1], index: 11, kind: output, shape index: {}]  }
   0x1   :  { %16 = sst [smem:[#allocation2]] %s1429_s10 }
   0x2 LB: > { %s977_s20 = sadd.s32 4294967295, %s1180_s19   ;;  %p981_p0 = scmp.ge.s32.totalorder %s1180_s19, 1  ;;  %s1180_s19 = sphi %s1247_s19, %s22_s19  }
   0x3   : > { %p352_p1 = scmp.lt.s32.totalorder %s1180_s19, 4 }
   0x5   : > { %p353_p2 = pnand %p981_p0, %p352_p1 }
   0x6   : > { %s982_s26 = sshll.u32 (!%p353_p2), %s977_s20, 1  ;;  %s902_s23 = sld [smem:[#allocation2]] (!%p353_p2) }
   0x7   : > { %356 = sbr.rel (%p353_p2) target bundleno = 801 (0x321), region = 64  ;;  %p400_p3 = scmp.lt.s32.totalorder (!%p353_p2), %s982_s26, 5 }
   0xc   : > { %v1144_v0 = vld [vmem:[%s1421_s2 + $0x78] sm:$0xff]   ;;  %v1182_v1 = vmov 0.0   ;;  %v1146_v3 = vld [vmem:[%s1421_s2 + $0x70] sm:$0xff]   ;;  %vm1183_vm0 = vmmov 0   ;;  %v1148_v5 = vld [vmem:[%s1421_s2 + $0x68] sm:$0xff]   ;;  %s1432_s26 = smov (!%p400_p3, %s982_s26), 5 }
   0xd   : > { %1062 = vmatprep.subr.bf16.mxu0 %v1182_v1  ;;  %1082 = vmatprep.subr.bf16.mxu1 %v1182_v1  ;;  %v1145_v2 = vld [vmem:[%s1421_s2 + $0x38] sm:$0xff]   ;;  %v1147_v4 = vld [vmem:[%s1421_s2 + $0x30] sm:$0xff]   ;;  %v1149_v6 = vld [vmem:[%s1421_s2 + $0x28] sm:$0xff]   ;;  %s1291_s18 = sshll.u32 %s1432_s26, 3  ;;  %vm822_vm1 = vcmask 523264   ;;  %vm878_vm2 = vcmask 261120  }
   0xe   : > { %1063 = vmatpush3.bf16.msra.mxu0 %v1144_v0  ;;  %1078 = vmatprep.mubr.msk.bf16.mxu0 %vm1183_vm0, %v1182_v1  ;;  %v1150_v7 = vld [vmem:[%s1421_s2 + $0x60] sm:$0xff]   ;;  %v1152_v9 = vld [vmem:[%s1421_s2 + $0x58] sm:$0xff]   ;;  %s1304_s25 = scalar_lea.vmem %s1420_s1, %s1291_s18  ;;  %s1311_s28 = scalar_lea.vmem %s1419_s0, %s1291_s18  ;;  %v1154_v11 = vld [vmem:[%s1421_s2 + $0x50] sm:$0xff]   ;;  %vm906_vm3 = vcmask 7168  }
   0xf   : > { %1083 = vmatpush3.bf16.msra.mxu1 %v1145_v2  ;;  %1064 = vmatprep.subr.bf16.mxu0 %v1182_v1  ;;  %v1151_v8 = vld [vmem:[%s1421_s2 + $0x20] sm:$0xff]   ;;  %v1153_v10 = vld [vmem:[%s1421_s2 + $0x18] sm:$0xff]   ;;  %v1155_v12 = vld [vmem:[%s1421_s2 + $0x10] sm:$0xff]   ;;  %s417_s27 = scalar_lea.vmem %s1430_s11, %s1291_s18 }
  0x10   : > { %1084 = vmatprep.subr.bf16.mxu1 %v1182_v1  ;;  %1098 = vmatprep.mubr.msk.bf16.mxu1 %vm1183_vm0, %v1182_v1  ;;  %v1156_v13 = vld [vmem:[%s1421_s2 + $0x48] sm:$0xff]   ;;  %v1158_v15 = vld [vmem:[%s1421_s2 + $0x40] sm:$0xff]   ;;  %v1162_v19 = vld [vmem:[%s1423_s4 + $0x38] sm:$0xff]  }
  0x11   : > { %v1157_v14 = vld [vmem:[%s1421_s2 + $0x8] sm:$0xff]   ;;  %v1159_v16 = vld [vmem:[%s1421_s2] sm:$0xff]   ;;  %v1163_v20 = vld [vmem:[%s1423_s4 + $0x30] sm:$0xff]  }
  0x12   : > { %1065 = vmatpush3.bf16.msra.mxu0 %v1146_v3  ;;  %v1160_v17 = vld [vmem:[%s1304_s25] ss:$8 sps:$4 sm:$0xff]   ;;  %v1166_v23 = vld [vmem:[%s1423_s4 + $0x18] sm:$0xff]   ;;  %v1167_v24 = vld [vmem:[%s1423_s4 + $0x10] sm:$0xff]  }
  0x13   : > { %1085 = vmatpush3.bf16.msra.mxu1 %v1147_v4  ;;  %1066 = vmatprep.subr.bf16.mxu0 %v1182_v1  ;;  %v1161_v18 = vld [vmem:[%s1311_s28] ss:$8 sps:$4 sm:$0xff]   ;;  %v1170_v27 = vld [vmem:[%s1425_s6 + $0x18] sm:$0xff]   ;;  %v1171_v44 = vld [vmem:[%s1425_s6 + $0x10] sm:$0xff]  }
  0x14   : > { %1086 = vmatprep.subr.bf16.mxu1 %v1182_v1  ;;  %v1164_v21 = vld [vmem:[%s1423_s4 + $0x28] sm:$0xff]   ;;  %v1165_v22 = vld [vmem:[%s1423_s4 + $0x20] sm:$0xff]  }
  0x15   : > { %v1168_v25 = vld [vmem:[%s1423_s4 + $0x8] sm:$0xff]   ;;  %v1169_v26 = vld [vmem:[%s1423_s4] sm:$0xff]  }
  0x16   : > { %1067 = vmatpush3.bf16.msra.mxu0 %v1148_v5  ;;  %v1008_v32 = vld [vmem:[%s1422_s3] ss:$0 sm:$0xff]  ;;  %v1172_v45 = vld [vmem:[%s1425_s6 + $0x8] sm:$0xff]  }
  0x17   : > { %1087 = vmatpush3.bf16.msra.mxu1 %v1149_v6  ;;  %1068 = vmatprep.subr.bf16.mxu0 %v1182_v1  ;;  %v1173_v46 = vld [vmem:[%s1425_s6] sm:$0xff]  }
  0x18   : > { %1088 = vmatprep.subr.bf16.mxu1 %v1182_v1  ;;  %v1009_v47 = vld [vmem:[%s1424_s5] ss:$0 sm:$0xff]  ;;  %v424_v57 = vld [vmem:[%s1311_s28 + $0x4] ss:$8 sps:$4 sm:$0xff]  }
  0x19   : > { %v426_v58 = vld [vmem:[%s1304_s25 + $0x4] ss:$8 sps:$4 sm:$0xff]   ;;  %v428_v59 = vunpack.c.l.bf16 %v424_v57  ;;  %v1024_v62 = vld [vmem:[%s1427_s8] ss:$0 sm:$0xff]  ;;  %v429_v0 = vunpack.c.h.bf16 %v424_v57 }
  0x1a   : > { %1069 = vmatpush3.bf16.msra.mxu0 %v1150_v7  ;;  %v430_v60 = vunpack.c.l.bf16 %v426_v58  ;;  %v1018_v6 = vld [vmem:[%s1426_s7] ss:$0 sm:$0xff] }
  0x1b   : > { %1089 = vmatpush3.bf16.msra.mxu1 %v1151_v8  ;;  %1070 = vmatprep.subr.bf16.mxu0 %v1182_v1 }
  0x1c   : > { %1090 = vmatprep.subr.bf16.mxu1 %v1182_v1  ;;  %v432_v61 = vmul.f32 %v430_v60, %v428_v59 }
  0x1e   : > { %1071 = vmatpush3.bf16.msra.mxu0 %v1152_v9  ;;  %v876_v63 = vmul.f32 %v1024_v62, %v432_v61 }
  0x1f   : > { %1091 = vmatpush3.bf16.msra.mxu1 %v1153_v10  ;;  %1072 = vmatprep.subr.bf16.mxu0 %v1182_v1  ;;  %v1025_v10 = vld [vmem:[%s1428_s9] ss:$0 sm:$0xff] }
  0x20   : > { %1092 = vmatprep.subr.bf16.mxu1 %v1182_v1  ;;  %v879_v2 = vsel %vm878_vm2, %v876_v63, 0.0 }
  0x21   : > { %880 = vadd.xlane.f32.xlu0 %v879_v2 }
  0x22   : > { %1073 = vmatpush3.bf16.msra.mxu0 %v1154_v11 }
  0x23   : > { %1093 = vmatpush3.bf16.msra.mxu1 %v1155_v12  ;;  %1074 = vmatprep.subr.bf16.mxu0 %v1182_v1 }
  0x24   : > { %1094 = vmatprep.subr.bf16.mxu1 %v1182_v1 }
  0x26   : > { %1075 = vmatpush3.bf16.msra.mxu0 %v1156_v13 }
  0x27   : > { %1095 = vmatpush3.bf16.msra.mxu1 %v1157_v14  ;;  %1076 = vmatprep.subr.bf16.mxu0 %v1182_v1 }
  0x28   : > { %1096 = vmatprep.subr.bf16.mxu1 %v1182_v1 }
  0x2a   : > { %1077 = vmatpush3.bf16.msra.mxu0 %v1158_v15 }
  0x2b   : > { %1097 = vmatpush3.bf16.msra.mxu1 %v1159_v16  ;;  %1102 = vmatprep.subr.bf16.mxu0 %v1182_v1 }
  0x2c   : > { %1122 = vmatprep.subr.bf16.mxu1 %v1182_v1 }
  0x2d   : > { %1079 = vmatmul.mubr.bf16.vlgmr.msra.gmra.mxu0 %v1160_v17 }
  0x2e   : > { %1099 = vmatmul.mubr.bf16.vlgmr.msra.gmra.mxu1 %v1161_v18  ;;  %1103 = vmatpush3.bf16.msra.mxu0 %v1162_v19 }
  0x2f   : > { %1104 = vmatprep.subr.bf16.mxu0 %v1182_v1  ;;  %1118 = vmatprep.mubr.msk.bf16.mxu0 %vm1183_vm0, %v1182_v1 }
  0x30   : > { %1130 = vmatprep.mubr.msk.bf16.mxu1 %vm1183_vm0, %v1182_v1  ;;  %1123 = vmatpush3.bf16.msra.mxu1 %v1170_v27 }
  0x31   : > { %1124 = vmatprep.subr.bf16.mxu1 %v1182_v1 }
  0x32   : > { %1105 = vmatpush3.bf16.msra.mxu0 %v1163_v20 }
  0x33   : > { %1106 = vmatprep.subr.bf16.mxu0 %v1182_v1 }
  0x34   : > { %1125 = vmatpush3.bf16.msra.mxu1 %v1171_v44 }
  0x35   : > { %1126 = vmatprep.subr.bf16.mxu1 %v1182_v1 }
  0x36   : > { %1107 = vmatpush3.bf16.msra.mxu0 %v1164_v21 }
  0x37   : > { %1108 = vmatprep.subr.bf16.mxu0 %v1182_v1 }
  0x38   : > { %1127 = vmatpush3.bf16.msra.mxu1 %v1172_v45 }
  0x39   : > { %1128 = vmatprep.subr.bf16.mxu1 %v1182_v1 }
  0x3a   : > { %1109 = vmatpush3.bf16.msra.mxu0 %v1165_v22  ;;  %v903_v22 = vstv %s902_s23 }
  0x3b   : > { %1110 = vmatprep.subr.bf16.mxu0 %v1182_v1 }
  0x3c   : > { %1129 = vmatpush3.bf16.msra.mxu1 %v1173_v46 }
  0x3e   : > { %1111 = vmatpush3.bf16.msra.mxu0 %v1166_v23 }
  0x3f   : > { %1112 = vmatprep.subr.bf16.mxu0 %v1182_v1 }
  0x42   : > { %1113 = vmatpush3.bf16.msra.mxu0 %v1167_v24 }
  0x43   : > { %1114 = vmatprep.subr.bf16.mxu0 %v1182_v1 }
  0x46   : > { %1115 = vmatpush3.bf16.msra.mxu0 %v1168_v25 }
  0x47   : > { %1116 = vmatprep.subr.bf16.mxu0 %v1182_v1  ;;  %v431_v1 = vunpack.c.h.bf16 %v426_v58 }
  0x49   : > { %v433_v3 = vmul.f32 %v431_v1, %v429_v0 }
  0x4a   : > { %1117 = vmatpush3.bf16.msra.mxu0 %v1169_v26 }
  0x4b   : > { %v877_v4 = vmul.f32 %v1024_v62, %v433_v3 }
  0x4d   : > { %v882_v5 = vsel %vm878_vm2, %v877_v4, 0.0 }
  0x4e   : > { %883 = vadd.xlane.f32.xlu1 %v882_v5 }
  0xaa   : > { %v881_v20 = vpop.xlane.xlu0 %880 }
  0xd7   : > { %v884_v21 = vpop.xlane.xlu1 %883 }
  0xed   : > { %v554_v28 = vpop.f32.mrf.mxu0 }
  0xee   : > { %v649_v29 = vpop.f32.mrf.mxu1 }
  0xef   : > { %v650_v30 = vadd.f32 %v649_v29, %v554_v28  ;;  %v1080_v31 = vpop.f32.mrf.mxu0 }
  0xf0   : > { %v1100_v33 = vpop.f32.mrf.mxu1 }
  0xf1   : > { %v557_v34 = vpop.f32.mrf.mxu0  ;;  %v663_v36 = vadd.f32 %v1008_v32, %v650_v30 }
  0xf2   : > { %v652_v35 = vpop.f32.mrf.mxu1 }
  0xf3   : > { %v653_v37 = vadd.f32 %v652_v35, %v557_v34  ;;  %v1081_v38 = vpop.f32.mrf.mxu0  ;;  %v665_v41 = vmax.f32 %v663_v36, 0.0 }
  0xf4   : > { %v1101_v39 = vpop.f32.mrf.mxu1 }
  0xf5   : > { %v664_v40 = vadd.f32 %v1008_v32, %v653_v37 }
  0xf7   : > { %v666_v42 = vmax.f32 %v664_v40, 0.0 }
  0xf9   : > { %v667_v43 = vpack.c.bf16 %v666_v42, %v665_v41 }
  0xfb   : > { %1119 = vmatmul.mubr.bf16.vlgmr.msra.gmra.mxu0 %v667_v43 }
 0x1bb   : > { %v773_v48 = vpop.f32.mrf.mxu0 }
 0x1bc   : > { %v774_v50 = vadd.f32 %v1009_v47, %v773_v48 }
 0x1bd   : > { %v1120_v49 = vpop.f32.mrf.mxu0 }
 0x1be   : > { %v780_v54 = vmax.f32 %v774_v50, 0.0 }
 0x1bf   : > { %v776_v51 = vpop.f32.mrf.mxu0 }
 0x1c0   : > { %v777_v52 = vadd.f32 %v1009_v47, %v776_v51 }
 0x1c1   : > { %v1121_v53 = vpop.f32.mrf.mxu0 }
 0x1c2   : > { %v781_v55 = vmax.f32 %v777_v52, 0.0 }
 0x1c4   : > { %v782_v56 = vpack.c.bf16 %v781_v55, %v780_v54 }
 0x1c6   : > { %1131 = vmatmul.mubr.msk.bf16.vlgmr.msra.gmra.mxu1 %vm822_vm1, %v782_v56 }
 0x286   : > { %v860_v7 = vpop.f32.mrf.mxu1 }
 0x287   : > { %v861_v8 = vadd.f32 %v1018_v6, %v860_v7 }
 0x288   : > { %v1132_v9 = vpop.f32.mrf.mxu1 }
 0x289   : > { %v867_v11 = vmax.f32 %v861_v8, 0.0 }
 0x28a   : > { %v863_v12 = vpop.f32.mrf.mxu1 }
 0x28b   : > { %v864_v13 = vadd.f32 %v1018_v6, %v863_v12  ;;  %v892_v14 = vmul.f32 %v1025_v10, %v867_v11 }
 0x28c   : > { %v1133_v15 = vpop.f32.mrf.mxu1 }
 0x28d   : > { %v868_v16 = vmax.f32 %v864_v13, 0.0  ;;  %v894_v17 = vsel %vm878_vm2, %v892_v14, 0.0 }
 0x28e   : > { %895 = vadd.xlane.f32.xlu0 %v894_v17 }
 0x28f   : > { %v893_v18 = vmul.f32 %v1025_v10, %v868_v16 }
 0x291   : > { %v897_v19 = vsel %vm878_vm2, %v893_v18, 0.0 }
 0x292   : > { %898 = vadd.xlane.f32.xlu1 %v897_v19 }
 0x317   : > { %v896_v23 = vpop.xlane.xlu0 %895 }
 0x318   : > { %v900_v24 = vadd.f32 %v896_v23, %v881_v20 }
 0x31a   : > { %v904_v25 = vadd.f32 %v903_v22, %v900_v24 }
 0x31b   : > { %v899_v26 = vpop.xlane.xlu1 %898 }
 0x31c   : > { %907 = vst.msk [vmem:[%s417_s27] sm:$0xff] %vm906_vm3, %v904_v25  ;;  %v901_v27 = vadd.f32 %v899_v26, %v884_v21 }
 0x31e   : > { %v905_v28 = vadd.f32 %v903_v22, %v901_v27 }
 0x320   : > { %908 = vst.msk [vmem:[%s417_s27 + $0x8] sm:$0xff] %vm906_vm3, %v905_v28 }
 0x321 PF: > { %s22_s19 = sadd.s32 1, %s1180_s19  }
 0x322   : > { %p19_p4 = scmp.ge.s32.totalorder %s22_s19, 5  }
 0x324   :  { %21 = sbr.rel (!%p19_p4) target bundleno = 2 (0x2), region = 97 }

</bundles_post_ra>
